<compile_context>
chip_gen: v5e
topology: v5e:2x2
jax: 0.10.0
libtpu: 0.0.40
codegen_flags: <defaults>
</compile_context>

<pallas_src>
import jax
import jax.numpy as jnp
from jax.experimental import pallas as pl
from jax.experimental.pallas import tpu as pltpu

NEG_SLOPE = 0.01   # nn.LeakyReLU default
BN_EPS = 1e-5      # nn.BatchNorm1d default


def _round_up(x, m):
    return (x + m - 1) // m * m


def fusion_kernel(app_ref, shp_ref, w1_ref, w2_ref, p_ref, out_ref):
    """Fused forward: two branch matmuls (bf16 operands, f32 accumulation)
    + bias + LeakyReLU, theta-weighted sum (theta pre-folded into W/b), and
    BatchNorm1d with batch statistics folded into one scale/shift FMA.

    p_ref rows: 0 = b1*t0, 1 = b2*t1, 2 = gamma, 3 = beta, 4..7 = zero pad.
    """
    p = p_ref[...]                       # [8, OUT] f32, one DMA for all params
    b1 = p[0:1, :]
    b2 = p[1:2, :]
    gamma = p[2:3, :]
    beta = p[3:4, :]

    a = jnp.dot(app_ref[...], w1_ref[...],
                preferred_element_type=jnp.float32) + b1
    a = jnp.where(a >= 0.0, a, NEG_SLOPE * a)        # LeakyReLU
    s = jnp.dot(shp_ref[...], w2_ref[...],
                preferred_element_type=jnp.float32) + b2
    s = jnp.where(s >= 0.0, s, NEG_SLOPE * s)
    agg = a + s                                      # softmax(theta) already folded in

    # BatchNorm1d (training mode): one-pass batch mean / biased batch var.
    inv_n = 1.0 / agg.shape[0]
    mean = jnp.sum(agg, axis=0, keepdims=True) * inv_n           # [1, OUT]
    ex2 = jnp.sum(agg * agg, axis=0, keepdims=True) * inv_n      # [1, OUT]
    var = jnp.maximum(ex2 - mean * mean, 0.0)
    scale = jax.lax.rsqrt(var + BN_EPS) * gamma                  # [1, OUT]
    shift = beta - mean * scale                                  # [1, OUT]
    out_ref[...] = (agg * scale + shift).astype(out_ref.dtype)


def prepare_fusion_params(w1, b1, w2, b2, theta, gamma, beta):
    """One-time parameter preprocessing (run at load time, NOT per forward)."""
    app_dim, out_dim = w1.shape
    shp_dim = w2.shape[0]
    app_pad = _round_up(app_dim, 8)
    shp_pad = _round_up(shp_dim, 8)

    # Stable 2-way softmax of theta (AggregationNet), computed once.
    th = theta.reshape(-1).astype(jnp.float32)
    th = th - jnp.max(th)
    te = jnp.exp(th)
    t = te / jnp.sum(te)                                         # (2,), >= 0

    # Fold theta into each branch (valid: LeakyReLU(c*x) = c*LeakyReLU(x) for
    # c >= 0), pad K to a sublane multiple, cast MXU operands to bf16.
    w1_f = jnp.pad(w1.astype(jnp.float32) * t[0],
                   ((0, app_pad - app_dim), (0, 0)))
    w2_f = jnp.pad(w2.astype(jnp.float32) * t[1],
                   ((0, shp_pad - shp_dim), (0, 0)))

    # Pack all epilogue params into one sublane-padded slab (single DMA).
    packed = jnp.zeros((8, out_dim), jnp.float32)
    packed = packed.at[0].set(b1.reshape(-1).astype(jnp.float32) * t[0])
    packed = packed.at[1].set(b2.reshape(-1).astype(jnp.float32) * t[1])
    packed = packed.at[2].set(gamma.reshape(-1).astype(jnp.float32))
    packed = packed.at[3].set(beta.reshape(-1).astype(jnp.float32))

    return {
        "w1": w1_f.astype(jnp.bfloat16),     # [app_pad, OUT]
        "w2": w2_f.astype(jnp.bfloat16),     # [shp_pad, OUT]
        "packed": packed,                    # [8, OUT]
        "app_dim": app_dim, "shp_dim": shp_dim,
        "app_pad": app_pad, "shp_pad": shp_pad,
        "out_dim": out_dim,
    }


def make_fusion_forward(prep):
    """Build the jitted forward. Preprocessed params are closed over, so XLA
    treats them as constants; only the tiny activation pad/cast runs per call."""
    w1c, w2c, packed = prep["w1"], prep["w2"], prep["packed"]
    app_dim, shp_dim = prep["app_dim"], prep["shp_dim"]
    app_pad, shp_pad = prep["app_pad"], prep["shp_pad"]
    out_dim = prep["out_dim"]

    @jax.jit
    def forward(app, shp):
        batch = app.shape[0]
        app_p = jnp.pad(app, ((0, 0), (0, app_pad - app_dim))).astype(jnp.bfloat16)
        shp_p = jnp.pad(shp, ((0, 0), (0, shp_pad - shp_dim))).astype(jnp.bfloat16)
        return pl.pallas_call(
            fusion_kernel,
            out_shape=jax.ShapeDtypeStruct((batch, out_dim), jnp.float32),
            # Grid-less call: whole-array VMEM blocks, no pipeline machinery.
            in_specs=[pl.BlockSpec(memory_space=pltpu.MemorySpace.VMEM)] * 5,
            out_specs=pl.BlockSpec(memory_space=pltpu.MemorySpace.VMEM),
        )(app_p, shp_p, w1c, w2c, packed)

    return forward


if __name__ == "__main__":
    # CONFIG.MODEL.APP_FEATURE_DIM = 32, shape dim fixed at 10,
    # out_features = CONFIG.MODEL.AGG_FEATURE_DIM = 128, CONFIG.MODEL.AGG = 'SUM'.
    B, APP_DIM, SHAPE_DIM, OUT = 8, 32, 10, 128

    key = jax.random.PRNGKey(0)
    k = jax.random.split(key, 8)

    w1 = jax.random.normal(k[0], (APP_DIM, OUT), jnp.float32) * (1.0 / APP_DIM ** 0.5)
    b1 = jax.random.normal(k[1], (1, OUT), jnp.float32) * 0.01
    w2 = jax.random.normal(k[2], (SHAPE_DIM, OUT), jnp.float32) * (1.0 / SHAPE_DIM ** 0.5)
    b2 = jax.random.normal(k[3], (1, OUT), jnp.float32) * 0.01
    theta = jax.random.normal(k[4], (1, 2), jnp.float32)                 # AggregationNet.theta
    gamma = 1.0 + 0.02 * jax.random.normal(k[5], (1, OUT), jnp.float32)  # bn.weight ~ N(1, 0.02)
    beta = jnp.zeros((1, OUT), jnp.float32)                              # bn.bias = 0

    app = jax.random.normal(k[6], (B, APP_DIM), jnp.float32)
    shp = jax.random.normal(k[7], (B, SHAPE_DIM), jnp.float32)

    prep = prepare_fusion_params(w1, b1, w2, b2, theta, gamma, beta)     # once
    forward = make_fusion_forward(prep)

    out = forward(app, shp)
    jax.block_until_ready(out)

    # --- Check 1 (tight): reference that mirrors the kernel's numerics
    # (same theta-folded bf16 operands, f32 accumulation, f32 epilogue).
    def ref_kernel_numerics(app, shp):
        app_p = jnp.pad(app, ((0, 0), (0, prep["app_pad"] - APP_DIM))).astype(jnp.bfloat16)
        shp_p = jnp.pad(shp, ((0, 0), (0, prep["shp_pad"] - SHAPE_DIM))).astype(jnp.bfloat16)
        a = jnp.dot(app_p, prep["w1"], preferred_element_type=jnp.float32) + prep["packed"][0:1]
        a = jnp.where(a >= 0, a, NEG_SLOPE * a)
        s = jnp.dot(shp_p, prep["w2"], preferred_element_type=jnp.float32) + prep["packed"][1:2]
        s = jnp.where(s >= 0, s, NEG_SLOPE * s)
        agg = a + s
        m = agg.mean(0, keepdims=True)
        v = ((agg - m) ** 2).mean(0, keepdims=True)
        return (agg - m) / jnp.sqrt(v + BN_EPS) * prep["packed"][2:3] + prep["packed"][3:4]

    r1 = ref_kernel_numerics(app, shp)
    assert jnp.allclose(out, r1, atol=5e-4, rtol=5e-4), float(jnp.max(jnp.abs(out - r1)))

    # --- Check 2 (sanity, looser): pure-f32 reference in the original
    # PyTorch op order (Linear -> LeakyReLU per branch, softmax(theta)
    # aggregation, training-mode BatchNorm1d). Looser tolerance accounts for
    # the kernel's bf16 MXU operands.
    def ref_spec(app, shp):
        a = app @ w1 + b1
        a = jnp.where(a >= 0, a, NEG_SLOPE * a)
        s = shp @ w2 + b2
        s = jnp.where(s >= 0, s, NEG_SLOPE * s)
        te = jnp.exp(theta)
        t = te / te.sum()
        agg = t[0, 0] * a + t[0, 1] * s
        m = agg.mean(0, keepdims=True)
        v = ((agg - m) ** 2).mean(0, keepdims=True)
        return (agg - m) / jnp.sqrt(v + BN_EPS) * gamma + beta

    r2 = ref_spec(app, shp)
    assert jnp.allclose(out, r2, atol=5e-2, rtol=5e-2), float(jnp.max(jnp.abs(out - r2)))

    print("KERNEL_OK")
</pallas_src>

<mosaic_0001>
module attributes {stable_mosaic.version = 11 : i64} {
  func.func @fusion_kernel(%arg0: memref<8x32xbf16, #tpu.memory_space<vmem>>, %arg1: memref<8x16xbf16, #tpu.memory_space<vmem>>, %arg2: memref<32x128xbf16, #tpu.memory_space<vmem>>, %arg3: memref<16x128xbf16, #tpu.memory_space<vmem>>, %arg4: memref<8x128xf32, #tpu.memory_space<vmem>>, %arg5: memref<8x128xf32, #tpu.memory_space<vmem>>) attributes {dimension_semantics = [], scalar_prefetch = 0 : i64, scratch_operands = 0 : i64, tpu.core_type = #tpu.core_type<tc>} {
    %c0 = arith.constant 0 : index
    %c0_0 = arith.constant 0 : index
    %0 = vector.load %arg4[%c0, %c0_0] : memref<8x128xf32, #tpu.memory_space<vmem>>, vector<8x128xf32>
    %1 = vector.extract_strided_slice %0 {offsets = [0, 0], sizes = [1, 128], strides = [1, 1]} : vector<8x128xf32> to vector<1x128xf32>
    %2 = vector.extract_strided_slice %0 {offsets = [1, 0], sizes = [1, 128], strides = [1, 1]} : vector<8x128xf32> to vector<1x128xf32>
    %3 = vector.extract_strided_slice %0 {offsets = [2, 0], sizes = [1, 128], strides = [1, 1]} : vector<8x128xf32> to vector<1x128xf32>
    %4 = vector.extract_strided_slice %0 {offsets = [3, 0], sizes = [1, 128], strides = [1, 1]} : vector<8x128xf32> to vector<1x128xf32>
    %c0_1 = arith.constant 0 : index
    %c0_2 = arith.constant 0 : index
    %5 = vector.load %arg0[%c0_1, %c0_2] : memref<8x32xbf16, #tpu.memory_space<vmem>>, vector<8x32xbf16>
    %c0_3 = arith.constant 0 : index
    %c0_4 = arith.constant 0 : index
    %6 = vector.load %arg2[%c0_3, %c0_4] : memref<32x128xbf16, #tpu.memory_space<vmem>>, vector<32x128xbf16>
    %cst = arith.constant dense<0.000000e+00> : vector<8x128xf32>
    %7 = tpu.matmul %5, %6, %cst {dimension_numbers = #tpu.dot_dimension_numbers<[1], [0], [0], [1], [0, 0, 1, 1], [], []>} : vector<8x32xbf16>, vector<32x128xbf16>, vector<8x128xf32> -> vector<8x128xf32>
    %8 = vector.broadcast %1 : vector<1x128xf32> to vector<8x128xf32>
    %9 = arith.addf %7, %8 : vector<8x128xf32>
    %cst_5 = arith.constant 0.000000e+00 : f32
    %10 = vector.broadcast %cst_5 : f32 to vector<8x128xf32>
    %11 = arith.cmpf oge, %9, %10 : vector<8x128xf32>
    %cst_6 = arith.constant 0.00999999977 : f32
    %12 = vector.broadcast %cst_6 : f32 to vector<8x128xf32>
    %13 = arith.mulf %12, %9 : vector<8x128xf32>
    %14 = arith.select %11, %9, %13 : vector<8x128xi1>, vector<8x128xf32>
    %c0_7 = arith.constant 0 : index
    %c0_8 = arith.constant 0 : index
    %15 = vector.load %arg1[%c0_7, %c0_8] : memref<8x16xbf16, #tpu.memory_space<vmem>>, vector<8x16xbf16>
    %c0_9 = arith.constant 0 : index
    %c0_10 = arith.constant 0 : index
    %16 = vector.load %arg3[%c0_9, %c0_10] : memref<16x128xbf16, #tpu.memory_space<vmem>>, vector<16x128xbf16>
    %cst_11 = arith.constant dense<0.000000e+00> : vector<8x128xf32>
    %17 = tpu.matmul %15, %16, %cst_11 {dimension_numbers = #tpu.dot_dimension_numbers<[1], [0], [0], [1], [0, 0, 1, 1], [], []>} : vector<8x16xbf16>, vector<16x128xbf16>, vector<8x128xf32> -> vector<8x128xf32>
    %18 = vector.broadcast %2 : vector<1x128xf32> to vector<8x128xf32>
    %19 = arith.addf %17, %18 : vector<8x128xf32>
    %cst_12 = arith.constant 0.000000e+00 : f32
    %20 = vector.broadcast %cst_12 : f32 to vector<8x128xf32>
    %21 = arith.cmpf oge, %19, %20 : vector<8x128xf32>
    %cst_13 = arith.constant 0.00999999977 : f32
    %22 = vector.broadcast %cst_13 : f32 to vector<8x128xf32>
    %23 = arith.mulf %22, %19 : vector<8x128xf32>
    %24 = arith.select %21, %19, %23 : vector<8x128xi1>, vector<8x128xf32>
    %25 = arith.addf %14, %24 : vector<8x128xf32>
    %cst_14 = arith.constant dense<0.000000e+00> : vector<128xf32>
    %26 = vector.multi_reduction <add>, %25, %cst_14 [0] : vector<8x128xf32> to vector<128xf32>
    %27 = vector.shape_cast %26 : vector<128xf32> to vector<1x128xf32>
    %cst_15 = arith.constant 1.250000e-01 : f32
    %28 = vector.broadcast %cst_15 : f32 to vector<1x128xf32>
    %29 = arith.mulf %27, %28 : vector<1x128xf32>
    %30 = arith.mulf %25, %25 : vector<8x128xf32>
    %cst_16 = arith.constant dense<0.000000e+00> : vector<128xf32>
    %31 = vector.multi_reduction <add>, %30, %cst_16 [0] : vector<8x128xf32> to vector<128xf32>
    %32 = vector.shape_cast %31 : vector<128xf32> to vector<1x128xf32>
    %cst_17 = arith.constant 1.250000e-01 : f32
    %33 = vector.broadcast %cst_17 : f32 to vector<1x128xf32>
    %34 = arith.mulf %32, %33 : vector<1x128xf32>
    %35 = arith.mulf %29, %29 : vector<1x128xf32>
    %36 = arith.subf %34, %35 : vector<1x128xf32>
    %cst_18 = arith.constant 0.000000e+00 : f32
    %37 = vector.broadcast %cst_18 : f32 to vector<1x128xf32>
    %38 = arith.maximumf %36, %37 : vector<1x128xf32>
    %cst_19 = arith.constant 9.99999974E-6 : f32
    %39 = vector.broadcast %cst_19 : f32 to vector<1x128xf32>
    %40 = arith.addf %38, %39 : vector<1x128xf32>
    %41 = math.rsqrt %40 : vector<1x128xf32>
    %42 = arith.mulf %41, %3 : vector<1x128xf32>
    %43 = arith.mulf %29, %42 : vector<1x128xf32>
    %44 = arith.subf %4, %43 : vector<1x128xf32>
    %45 = vector.broadcast %42 : vector<1x128xf32> to vector<8x128xf32>
    %46 = arith.mulf %25, %45 : vector<8x128xf32>
    %47 = vector.broadcast %44 : vector<1x128xf32> to vector<8x128xf32>
    %48 = arith.addf %46, %47 : vector<8x128xf32>
    %c0_20 = arith.constant 0 : index
    %c0_21 = arith.constant 0 : index
    %49 = vector.load %arg5[%c0_20, %c0_21] : memref<8x128xf32, #tpu.memory_space<vmem>>, vector<8x128xf32>
    tpu.vector_store %arg5[%c0_20, %c0_21], %48 {strides = array<i32>} : memref<8x128xf32, #tpu.memory_space<vmem>>, vector<8x128xf32>,
    return
  }
}

</mosaic_0001>

<bundles_post_ra>
// kernel: forward.1
= control target key start
LH: loop header
LB: loop body
LE: loop exit
PB: predicated region body
PF: predicated region fallthrough
CT: control target
= control target key end

     0   :  { %10 = vsyncpa [#allocation3], 0  ;;  %s295_s0 = inlined_call_operand.vmem [shape: bf16[8,32], index: 0, kind: input, shape index: {}]   ;;  %s296_s1 = inlined_call_operand.vmem [shape: bf16[8,16], index: 1, kind: input, shape index: {}]   ;;  %s297_s2 = inlined_call_operand.vmem [shape: bf16[32,128], index: 2, kind: input, shape index: {}]   ;;  %s298_s3 = inlined_call_operand.hbm [shape: bf16[16,128], index: 3, kind: input, shape index: {}]   ;;  %s299_s4 = inlined_call_operand.vmem [shape: f32[8,128], index: 4, kind: input, shape index: {}]   ;;  %s300_s5 = inlined_call_operand.hbm [shape: f32[8,128], index: 5, kind: output, shape index: {}]  }
   0x1   :  { %11 = vsyncpa [#allocation4], 0  ;;  %s22_s20 = sshll.u32 %s298_s3, 4  ;;  %s240_s21 = smov [#allocation2]   ;;  %s23_s20 = int_to_ptr.hbm [resolvable:$true] %s22_s20 }
   0x2   :  { %s24_s22 = sshll.u32 %s240_s21, 4  ;;  %s241_s23 = smov 64   ;;  %s25_s22 = int_to_ptr.vmem [resolvable:$true] %s24_s22 }
   0x3   :  { %s242_s24 = smov 4  }
   0x4   :  { %30 = dma.hbm_to_vmem [thread:$0]  %s23_s20, 128, %s25_s22, [#allocation3], %s241_s23, %s241_s23, %s242_s24  }
   0x5   :  { %236 = dma.done.wait [#allocation3], 128  }
   0x6   :  { %237 = vsyncadd [#allocation3], 4294967168  ;;  %v180_v0 = vld [vmem:[%s297_s2 + $0x8] sm:$0xff]  ;;  %v181_v1 = vld [vmem:[#allocation2] sm:$0xff]  ;;  %vm87_vm0 = vcmask 130048   ;;  %vm57_vm1 = vcmask 261120  }
   0x7   :  { %67 = vmatpush.bf16.msra.mxu0 %v180_v0  ;;  %98 = vmatpush.bf16.msra.mxu1 %v181_v1  ;;  %v77_v2 = vld [vmem:[%s296_s1] sm:$0xf]  ;;  %s155_s9 = sshll.u32 %s300_s5, 4  ;;  %s156_s9 = int_to_ptr.hbm [resolvable:$true] %s155_s9 }
   0x8   :  { %v179_v3 = vld [vmem:[%s297_s2] sm:$0xff] }
   0x9   :  { %v39_v4 = vld [vmem:[%s295_s0] sm:$0xf]  ;;  %s243_s0 = smov [#allocation5]  }
   0xa   :  { %178 = vmatmul.msk.bf16.vlgmr.msra.gmra.mxu1 %vm87_vm0, %v77_v2  ;;  %v38_v5 = vld [vmem:[%s299_s4] sm:$0xff]  ;;  %s153_s1 = sshll.u32 %s243_s0, 4  ;;  %s154_s1 = int_to_ptr.vmem [resolvable:$true] %s153_s1 }
   0xb   :  { %68 = vmatpush.bf16.msra.mxu0 %v179_v3  ;;  %v80_v6 = vperm.slane %v38_v5, 1  ;;  %v44_v9 = vperm.slane %v38_v5, 0 }
   0xe   :  { %173 = vmatmul.msk.bf16.vlgmr.msra.gmra.mxu0 %vm57_vm1, %v39_v4 }
  0x87   :  { %v100_v7 = vpop.f32.mrf.mxu1 }
  0x88   :  { %v101_v8 = vadd.f32 %v100_v7, %v80_v6 }
  0x8a   :  { %v105_v11 = vmul.f32 0.01, %v101_v8  ;;  %vm104_vm2 = vcmp.ge.f32.partialorder %v101_v8, 0.0 }
  0x8b   :  { %v70_v10 = vpop.f32.mrf.mxu0 }
  0x8c   :  { %v71_v12 = vadd.f32 %v70_v10, %v44_v9  ;;  %v106_v15 = vsel %vm104_vm2, %v101_v8, %v105_v11 }
  0x8e   :  { %vm74_vm3 = vcmp.ge.f32.partialorder %v71_v12, 0.0  ;;  %v75_v13 = vmul.f32 0.01, %v71_v12 }
  0x8f   :  { %v102_v14 = vpop.f32.mrf.mxu1 }
  0x90   :  { %v76_v16 = vsel %vm74_vm3, %v71_v12, %v75_v13 }
  0x91   :  { %v107_v17 = vadd.f32 %v106_v15, %v76_v16 }
  0x93   :  { %v108_v18 = vrot.slane %v107_v17, 4  ;;  %v115_v19 = vmul.f32 %v107_v17, %v107_v17  ;;  %v72_v20 = vpop.f32.mrf.mxu0 }
  0x95   :  { %v109_v21 = vadd.f32 %v108_v18, %v107_v17  ;;  %v116_v22 = vrot.slane %v115_v19, 4 }
  0x97   :  { %v110_v23 = vrot.slane %v109_v21, 2  ;;  %v117_v24 = vadd.f32 %v116_v22, %v115_v19 }
  0x99   :  { %v118_v25 = vrot.slane %v117_v24, 2  ;;  %v111_v26 = vadd.f32 %v110_v23, %v109_v21 }
  0x9b   :  { %v119_v27 = vadd.f32 %v118_v25, %v117_v24  ;;  %v112_v28 = vrot.slane %v111_v26, 1 }
  0x9d   :  { %v120_v29 = vrot.slane %v119_v27, 1  ;;  %v113_v30 = vadd.f32 %v112_v28, %v111_v26 }
  0x9f   :  { %v114_v31 = vmul.f32 0.125, %v113_v30  ;;  %v121_v32 = vadd.f32 %v120_v29, %v119_v27 }
  0xa1   :  { %v122_v33 = vmul.f32 0.125, %v121_v32  ;;  %v123_v34 = vmul.f32 %v114_v31, %v114_v31 }
  0xa3   :  { %v124_v35 = vsub.f32 %v122_v33, %v123_v34 }
  0xa5   :  { %v125_v36 = vmax.f32 %v124_v35, 0.0 }
  0xa7   :  { %v126_v37 = vadd.f32 1e-05, %v125_v36 }
  0xa9   :  { %186 = vrsqrt.f32 %v126_v37  ;;  %vm133_vm5 = vweird.f32 %v126_v37 }
  0xaf   :  { %v187_v38 = vpop.eup %186 }
  0xb0   :  { %v128_v39 = vmul.f32 %v187_v38, %v126_v37  ;;  %vm134_vm4 = vweird.f32 %v187_v38 }
  0xb1   :  { %vm135_vm6 = vmor %vm133_vm5, %vm134_vm4 }
  0xb2   :  { %v129_v40 = vmul.f32 %v187_v38, %v128_v39 }
  0xb4   :  { %v130_v41 = vmul.f32 0.5, %v129_v40 }
  0xb6   :  { %v131_v42 = vsub.f32 1.5, %v130_v41 }
  0xb8   :  { %v132_v43 = vmul.f32 %v187_v38, %v131_v42 }
  0xba   :  { %v136_v44 = vsel %vm135_vm6, %v187_v38, %v132_v43 }
  0xbb   :  { %v137_v45 = vmul.f32 %v136_v44, %v38_v5 }
  0xbd   :  { %v138_v46 = vmul.f32 %v137_v45, %v114_v31  ;;  %v143_v48 = vperm.slane %v137_v45, 2 }
  0xbf   :  { %v140_v47 = vrot.slane %v138_v46, 7  ;;  %v144_v50 = vmul.f32 %v143_v48, %v107_v17 }
  0xc1   :  { %v142_v49 = vsub.f32 %v38_v5, %v140_v47 }
  0xc3   :  { %v145_v51 = vperm.slane %v142_v49, 3 }
  0xc5   :  { %v146_v52 = vadd.f32 %v145_v51, %v144_v50 }
  0xc7   :  { %147 = vst [vmem:[#allocation5] sm:$0xff] %v146_v52 }
  0xc8   :  { %158 = dma.vmem_to_hbm [thread:$0]  %s154_s1, 128, %s156_s9, [#allocation4]  }
  0xc9   :  { %238 = dma.done.wait [#allocation4], 128  }
  0xca   :  { %239 = vsyncadd [#allocation4], 4294967168 }
  0xcb   :  { %163 = vsyncpa [#allocation3], 1 }
  0xcc   :  { %164 = vsyncpa [#allocation4], 1 }

</bundles_post_ra>
